<compile_context>
chip_gen: v7x
topology: tpu7x:2x2x1
jax: 0.10.0
libtpu: 0.0.40
codegen_flags: <defaults>
</compile_context>

<pallas_src>
import jax
import jax.numpy as jnp
from jax.experimental import pallas as pl
from jax.experimental.pallas import tpu as pltpu

LANES = 128
MAX_TILE_R = 512   # 512 sublanes x 128 lanes x 4 B x C=4  ~= 1 MiB per input per step


def _softplus(v):
    # Stable BCE-with-logits building block: softplus(v) = max(v,0) + log(1+exp(-|v|)).
    return jnp.maximum(v, 0.0) + jnp.log(1.0 + jnp.exp(-jnp.abs(v)))


def _fused_disc_loss_kernel(x_ref, t_ref, wg_ref, bg_ref, wdi_ref, wdc_ref,
                            bd_ref, o_ref, acc_ref):
    """Generator + discriminator(fake & real) + BCE partial sums, fully fused.

    x_ref, t_ref : (C, TILE_R, 128) VMEM tiles of input / target pixels.
    wg (C,C), bg (C,), wd_img (C,), wd_cond (C,), bd (1,) : SMEM scalars.
    o_ref (1, 128)        : per-batch lane partial sums, written at finalize.
    acc_ref (TILE_R, 128) : f32 accumulator slab, resident across the R axis.
    """
    i = pl.program_id(1)
    nsteps = pl.num_programs(1)
    c = x_ref.shape[0]

    @pl.when(i == 0)
    def _init():
        acc_ref[...] = jnp.zeros_like(acc_ref)

    # Full (TILE_R, 128) slabs per channel -> dense (8,128) vreg utilization.
    xs = [x_ref[ci].astype(jnp.float32) for ci in range(c)]
    ts = [t_ref[ci].astype(jnp.float32) for ci in range(c)]

    bd = bd_ref[0]

    # Shared discriminator condition term + real-image term (biases folded into
    # the first FMA; no explicit zero/bias broadcasts).
    cond = bd + wdc_ref[0] * xs[0]
    d_real = wdi_ref[0] * ts[0]
    for ci in range(1, c):
        cond = cond + wdc_ref[ci] * xs[ci]
        d_real = d_real + wdi_ref[ci] * ts[ci]
    d_real = d_real + cond

    # Generator fused in and contracted straight into the fake logit (the (P,C)
    # generator activation never touches HBM).
    # TODO(synk): G_out.detach() only matters for backward; preserve it with a
    # custom_vjp if a backward pass is ever added (forward value is unaffected).
    d_fake = cond
    for co in range(c):
        g = bg_ref[co] + wg_ref[0, co] * xs[0]
        for ci in range(1, c):
            g = g + wg_ref[ci, co] * xs[ci]
        d_fake = d_fake + wdi_ref[co] * jnp.tanh(g)

    # BCEWithLogits: target 0 -> softplus(x), target 1 -> softplus(-x).
    # Both terms share the same denominator -> single accumulator slab.
    acc_ref[...] += _softplus(d_fake) + _softplus(-d_real)

    @pl.when(i == nsteps - 1)
    def _finalize():
        # Per-batch partial sums reduced over sublanes -> lane-dense (1,128) row.
        o_ref[...] = jnp.sum(acc_ref[...], axis=0, keepdims=True)


def disc_loss_forward(input_nchw, target_nchw, params, max_tile_r=MAX_TILE_R):
    """Equivalent of DiscLoss.forward(input, gen, disc, target_imag) (forward only)."""
    n, c, h, w = input_nchw.shape
    hw = h * w

    # Lane-aligned pixel layout: (N, C, H, W) -> (N, C, R, 128).  Pure trailing
    # dim merge/split => free; a pad copy happens only if H*W % 128 != 0.
    r_needed = pl.cdiv(hw, LANES)
    if r_needed <= max_tile_r:
        tile_r = r_needed          # one R step per batch; block == full extent
        r_pad = r_needed
    else:
        tile_r = max_tile_r        # multiple of 8 -> valid (8,128)-aligned block
        r_pad = pl.cdiv(r_needed, tile_r) * tile_r
    hw_pad = r_pad * LANES

    x = input_nchw.reshape(n, c, hw)
    t = target_nchw.reshape(n, c, hw)
    if hw_pad != hw:
        x = jnp.pad(x, ((0, 0), (0, 0), (0, hw_pad - hw)))
        t = jnp.pad(t, ((0, 0), (0, 0), (0, hw_pad - hw)))
    x = x.reshape(n, c, r_pad, LANES)
    t = t.reshape(n, c, r_pad, LANES)

    f32 = jnp.float32
    wg = params["wg"].astype(f32)
    bg = params["bg"].astype(f32)
    wdi = params["wd_img"].astype(f32)
    wdc = params["wd_cond"].astype(f32)
    bd = params["bd"].astype(f32)

    grid = (n, r_pad // tile_r)

    partials = pl.pallas_call(
        _fused_disc_loss_kernel,
        out_shape=jax.ShapeDtypeStruct((1, n * LANES), jnp.float32),
        grid_spec=pltpu.PrefetchScalarGridSpec(
            num_scalar_prefetch=0,
            grid=grid,
            in_specs=[
                pl.BlockSpec((pl.Squeezed(), c, tile_r, LANES),
                             lambda b, i: (b, 0, i, 0)),              # input pixels
                pl.BlockSpec((pl.Squeezed(), c, tile_r, LANES),
                             lambda b, i: (b, 0, i, 0)),              # target pixels
                pl.BlockSpec(memory_space=pltpu.MemorySpace.SMEM),    # wg (C, C)
                pl.BlockSpec(memory_space=pltpu.MemorySpace.SMEM),    # bg (C,)
                pl.BlockSpec(memory_space=pltpu.MemorySpace.SMEM),    # wd_img (C,)
                pl.BlockSpec(memory_space=pltpu.MemorySpace.SMEM),    # wd_cond (C,)
                pl.BlockSpec(memory_space=pltpu.MemorySpace.SMEM),    # bd (1,)
            ],
            out_specs=pl.BlockSpec((1, LANES), lambda b, i: (0, b)),
            scratch_shapes=[pltpu.VMEM((tile_r, LANES), jnp.float32)],
        ),
        compiler_params=pltpu.CompilerParams(
            # Batch axis -> both TensorCores on v7x (per-batch output blocks, no
            # shared accumulator across cores); R axis is the reduction.
            dimension_semantics=("parallel", "arbitrary")),
    )(x, t, wg, bg, wdi, wdc, bd)

    loss_sum = jnp.sum(partials)

    # Analytic removal of the zero-padded columns' contribution (exact: padded
    # pixels have x = t = 0, so d_fake = sum(wd_img*tanh(bg)) + bd, d_real = bd).
    if hw_pad != hw:
        d_fake_pad = jnp.sum(wdi * jnp.tanh(bg)) + bd[0]
        d_real_pad = bd[0]
        pad_pixels = n * (hw_pad - hw)
        loss_sum = loss_sum - pad_pixels * (_softplus(d_fake_pad) + _softplus(-d_real_pad))

    total = n * hw
    # (mean(fake_loss) + mean(real_loss)) / 2 over all N*H*W logits.
    return loss_sum * (0.5 / total)


# ---------------------------------------------------------------------------
# Pure-JAX reference for correctness check
# ---------------------------------------------------------------------------
def _reference(input_nchw, target_nchw, params):
    n, c, h, w = input_nchw.shape
    hi = jax.lax.Precision.HIGHEST   # keep the reference in true f32 (no bf16 MXU passes)
    x = jnp.transpose(input_nchw, (0, 2, 3, 1)).reshape(-1, c).astype(jnp.float32)
    t = jnp.transpose(target_nchw, (0, 2, 3, 1)).reshape(-1, c).astype(jnp.float32)
    g = jnp.tanh(jnp.einsum("pc,co->po", x, params["wg"], precision=hi)
                 + params["bg"][None, :])
    cond = jnp.einsum("pc,c->p", x, params["wd_cond"], precision=hi)[:, None] \
        + params["bd"][None, :]
    d_fake = jnp.einsum("pc,c->p", g, params["wd_img"], precision=hi)[:, None] + cond
    d_real = jnp.einsum("pc,c->p", t, params["wd_img"], precision=hi)[:, None] + cond
    return (jnp.mean(_softplus(d_fake)) + jnp.mean(_softplus(-d_real))) / 2.0


# ---------------------------------------------------------------------------
# Main
# ---------------------------------------------------------------------------
if __name__ == "__main__":
    key = jax.random.PRNGKey(0)
    k_in, k_wg, k_bg, k_wi, k_wc, k_bd = jax.random.split(key, 6)

    C = 4
    params = {
        # TODO(synk): `gen`/`disc` are caller-supplied nn.Modules in PyTorch;
        # these are deterministic synthetic 1x1-conv stand-ins.
        "wg": 0.3 * jax.random.normal(k_wg, (C, C), dtype=jnp.float32),
        "bg": 0.1 * jax.random.normal(k_bg, (C,), dtype=jnp.float32),
        "wd_img": 0.3 * jax.random.normal(k_wi, (C,), dtype=jnp.float32),
        "wd_cond": 0.3 * jax.random.normal(k_wc, (C,), dtype=jnp.float32),
        "bd": 0.1 * jax.random.normal(k_bd, (1,), dtype=jnp.float32),
    }

    # Configs:
    #  1) primary small demo (one R step per batch)
    #  2) multi-step reduction over the "arbitrary" R axis with (8,128) blocks
    #  3) H*W not lane-aligned -> exercises the analytic padding correction
    configs = [
        ((2, C, 16, 16), MAX_TILE_R),
        ((2, C, 32, 64), 8),
        ((1, C, 12, 12), MAX_TILE_R),
    ]

    for idx, (shape, mtr) in enumerate(configs):
        ki, kt = jax.random.split(jax.random.fold_in(k_in, idx))
        input_img = jax.random.normal(ki, shape, dtype=jnp.float32)
        target_img = jax.random.normal(kt, shape, dtype=jnp.float32)

        loss = jax.block_until_ready(
            disc_loss_forward(input_img, target_img, params, max_tile_r=mtr))
        ref = jax.block_until_ready(_reference(input_img, target_img, params))

        assert loss.shape == (), f"expected scalar loss, got {loss.shape}"
        assert jnp.allclose(loss, ref, rtol=1e-4, atol=1e-5), (shape, loss, ref)

    print("KERNEL_OK")
</pallas_src>

<mosaic_0001>
module attributes {stable_mosaic.version = 11 : i64} {
  func.func @_fused_disc_loss_kernel(%arg0: i32, %arg1: i32, %arg2: memref<1x4x2x128xf32, #tpu.memory_space<vmem>>, %arg3: memref<1x4x2x128xf32, #tpu.memory_space<vmem>>, %arg4: memref<4x4xf32, #tpu.memory_space<smem>>, %arg5: memref<4xf32, #tpu.memory_space<smem>>, %arg6: memref<4xf32, #tpu.memory_space<smem>>, %arg7: memref<4xf32, #tpu.memory_space<smem>>, %arg8: memref<1xf32, #tpu.memory_space<smem>>, %arg9: memref<1x128xf32, #tpu.memory_space<vmem>>, %arg10: memref<2x128xf32, #tpu.memory_space<vmem>>) attributes {dimension_semantics = [#tpu.dimension_semantics<parallel>, #tpu.dimension_semantics<arbitrary>], iteration_bounds = array<i64: 2, 1>, scalar_prefetch = 0 : i64, scratch_operands = 1 : i64, tpu.core_type = #tpu.core_type<tc>, window_params = [{transform_indices = @transform_0, window_bounds = array<i64: 1, 4, 2, 128>}, {transform_indices = @transform_1, window_bounds = array<i64: 1, 4, 2, 128>}, {transform_indices = @transform_2, window_bounds = array<i64: 4, 4>}, {transform_indices = @transform_3, window_bounds = array<i64: 4>}, {transform_indices = @transform_4, window_bounds = array<i64: 4>}, {transform_indices = @transform_5, window_bounds = array<i64: 4>}, {transform_indices = @transform_6, window_bounds = array<i64: 1>}, {transform_indices = @transform_7, window_bounds = array<i64: 1, 128>}]} {
    %c0_i32 = arith.constant 0 : i32
    %0 = arith.cmpi eq, %arg1, %c0_i32 : i32
    %1 = arith.extui %0 : i1 to i32
    %c0_i32_0 = arith.constant 0 : i32
    %2 = arith.cmpi ne, %1, %c0_i32_0 : i32
    scf.if %2 {
      %cst_90 = arith.constant 0.000000e+00 : f32
      %174 = vector.broadcast %cst_90 : f32 to vector<2x128xf32>
      %c0_91 = arith.constant 0 : index
      %c0_92 = arith.constant 0 : index
      %175 = vector.load %arg10[%c0_91, %c0_92] : memref<2x128xf32, #tpu.memory_space<vmem>>, vector<2x128xf32>
      tpu.vector_store %arg10[%c0_91, %c0_92], %174 {strides = array<i32>} : memref<2x128xf32, #tpu.memory_space<vmem>>, vector<2x128xf32>,
    } else {
    }
    %c0 = arith.constant 0 : index
    %c0_1 = arith.constant 0 : index
    %c0_2 = arith.constant 0 : index
    %c0_3 = arith.constant 0 : index
    %3 = vector.load %arg2[%c0, %c0_1, %c0_2, %c0_3] : memref<1x4x2x128xf32, #tpu.memory_space<vmem>>, vector<1x1x2x128xf32>
    %4 = vector.shape_cast %3 : vector<1x1x2x128xf32> to vector<2x128xf32>
    %c0_4 = arith.constant 0 : index
    %c1 = arith.constant 1 : index
    %c0_5 = arith.constant 0 : index
    %c0_6 = arith.constant 0 : index
    %5 = vector.load %arg2[%c0_4, %c1, %c0_5, %c0_6] : memref<1x4x2x128xf32, #tpu.memory_space<vmem>>, vector<1x1x2x128xf32>
    %6 = vector.shape_cast %5 : vector<1x1x2x128xf32> to vector<2x128xf32>
    %c0_7 = arith.constant 0 : index
    %c2 = arith.constant 2 : index
    %c0_8 = arith.constant 0 : index
    %c0_9 = arith.constant 0 : index
    %7 = vector.load %arg2[%c0_7, %c2, %c0_8, %c0_9] : memref<1x4x2x128xf32, #tpu.memory_space<vmem>>, vector<1x1x2x128xf32>
    %8 = vector.shape_cast %7 : vector<1x1x2x128xf32> to vector<2x128xf32>
    %c0_10 = arith.constant 0 : index
    %c3 = arith.constant 3 : index
    %c0_11 = arith.constant 0 : index
    %c0_12 = arith.constant 0 : index
    %9 = vector.load %arg2[%c0_10, %c3, %c0_11, %c0_12] : memref<1x4x2x128xf32, #tpu.memory_space<vmem>>, vector<1x1x2x128xf32>
    %10 = vector.shape_cast %9 : vector<1x1x2x128xf32> to vector<2x128xf32>
    %c0_13 = arith.constant 0 : index
    %c0_14 = arith.constant 0 : index
    %c0_15 = arith.constant 0 : index
    %c0_16 = arith.constant 0 : index
    %11 = vector.load %arg3[%c0_13, %c0_14, %c0_15, %c0_16] : memref<1x4x2x128xf32, #tpu.memory_space<vmem>>, vector<1x1x2x128xf32>
    %12 = vector.shape_cast %11 : vector<1x1x2x128xf32> to vector<2x128xf32>
    %c0_17 = arith.constant 0 : index
    %c1_18 = arith.constant 1 : index
    %c0_19 = arith.constant 0 : index
    %c0_20 = arith.constant 0 : index
    %13 = vector.load %arg3[%c0_17, %c1_18, %c0_19, %c0_20] : memref<1x4x2x128xf32, #tpu.memory_space<vmem>>, vector<1x1x2x128xf32>
    %14 = vector.shape_cast %13 : vector<1x1x2x128xf32> to vector<2x128xf32>
    %c0_21 = arith.constant 0 : index
    %c2_22 = arith.constant 2 : index
    %c0_23 = arith.constant 0 : index
    %c0_24 = arith.constant 0 : index
    %15 = vector.load %arg3[%c0_21, %c2_22, %c0_23, %c0_24] : memref<1x4x2x128xf32, #tpu.memory_space<vmem>>, vector<1x1x2x128xf32>
    %16 = vector.shape_cast %15 : vector<1x1x2x128xf32> to vector<2x128xf32>
    %c0_25 = arith.constant 0 : index
    %c3_26 = arith.constant 3 : index
    %c0_27 = arith.constant 0 : index
    %c0_28 = arith.constant 0 : index
    %17 = vector.load %arg3[%c0_25, %c3_26, %c0_27, %c0_28] : memref<1x4x2x128xf32, #tpu.memory_space<vmem>>, vector<1x1x2x128xf32>
    %18 = vector.shape_cast %17 : vector<1x1x2x128xf32> to vector<2x128xf32>
    %c0_29 = arith.constant 0 : index
    %19 = memref.load %arg8[%c0_29] : memref<1xf32, #tpu.memory_space<smem>>
    %c0_30 = arith.constant 0 : index
    %20 = memref.load %arg7[%c0_30] : memref<4xf32, #tpu.memory_space<smem>>
    %21 = vector.broadcast %20 : f32 to vector<2x128xf32>
    %22 = arith.mulf %21, %4 : vector<2x128xf32>
    %23 = vector.broadcast %19 : f32 to vector<2x128xf32>
    %24 = arith.addf %23, %22 : vector<2x128xf32>
    %c0_31 = arith.constant 0 : index
    %25 = memref.load %arg6[%c0_31] : memref<4xf32, #tpu.memory_space<smem>>
    %26 = vector.broadcast %25 : f32 to vector<2x128xf32>
    %27 = arith.mulf %26, %12 : vector<2x128xf32>
    %c1_32 = arith.constant 1 : index
    %28 = memref.load %arg7[%c1_32] : memref<4xf32, #tpu.memory_space<smem>>
    %29 = vector.broadcast %28 : f32 to vector<2x128xf32>
    %30 = arith.mulf %29, %6 : vector<2x128xf32>
    %31 = arith.addf %24, %30 : vector<2x128xf32>
    %c1_33 = arith.constant 1 : index
    %32 = memref.load %arg6[%c1_33] : memref<4xf32, #tpu.memory_space<smem>>
    %33 = vector.broadcast %32 : f32 to vector<2x128xf32>
    %34 = arith.mulf %33, %14 : vector<2x128xf32>
    %35 = arith.addf %27, %34 : vector<2x128xf32>
    %c2_34 = arith.constant 2 : index
    %36 = memref.load %arg7[%c2_34] : memref<4xf32, #tpu.memory_space<smem>>
    %37 = vector.broadcast %36 : f32 to vector<2x128xf32>
    %38 = arith.mulf %37, %8 : vector<2x128xf32>
    %39 = arith.addf %31, %38 : vector<2x128xf32>
    %c2_35 = arith.constant 2 : index
    %40 = memref.load %arg6[%c2_35] : memref<4xf32, #tpu.memory_space<smem>>
    %41 = vector.broadcast %40 : f32 to vector<2x128xf32>
    %42 = arith.mulf %41, %16 : vector<2x128xf32>
    %43 = arith.addf %35, %42 : vector<2x128xf32>
    %c3_36 = arith.constant 3 : index
    %44 = memref.load %arg7[%c3_36] : memref<4xf32, #tpu.memory_space<smem>>
    %45 = vector.broadcast %44 : f32 to vector<2x128xf32>
    %46 = arith.mulf %45, %10 : vector<2x128xf32>
    %47 = arith.addf %39, %46 : vector<2x128xf32>
    %c3_37 = arith.constant 3 : index
    %48 = memref.load %arg6[%c3_37] : memref<4xf32, #tpu.memory_space<smem>>
    %49 = vector.broadcast %48 : f32 to vector<2x128xf32>
    %50 = arith.mulf %49, %18 : vector<2x128xf32>
    %51 = arith.addf %43, %50 : vector<2x128xf32>
    %52 = arith.addf %51, %47 : vector<2x128xf32>
    %c0_38 = arith.constant 0 : index
    %53 = memref.load %arg5[%c0_38] : memref<4xf32, #tpu.memory_space<smem>>
    %c0_39 = arith.constant 0 : index
    %c0_40 = arith.constant 0 : index
    %54 = memref.load %arg4[%c0_39, %c0_40] : memref<4x4xf32, #tpu.memory_space<smem>>
    %55 = vector.broadcast %54 : f32 to vector<2x128xf32>
    %56 = arith.mulf %55, %4 : vector<2x128xf32>
    %57 = vector.broadcast %53 : f32 to vector<2x128xf32>
    %58 = arith.addf %57, %56 : vector<2x128xf32>
    %c1_41 = arith.constant 1 : index
    %c0_42 = arith.constant 0 : index
    %59 = memref.load %arg4[%c1_41, %c0_42] : memref<4x4xf32, #tpu.memory_space<smem>>
    %60 = vector.broadcast %59 : f32 to vector<2x128xf32>
    %61 = arith.mulf %60, %6 : vector<2x128xf32>
    %62 = arith.addf %58, %61 : vector<2x128xf32>
    %c2_43 = arith.constant 2 : index
    %c0_44 = arith.constant 0 : index
    %63 = memref.load %arg4[%c2_43, %c0_44] : memref<4x4xf32, #tpu.memory_space<smem>>
    %64 = vector.broadcast %63 : f32 to vector<2x128xf32>
    %65 = arith.mulf %64, %8 : vector<2x128xf32>
    %66 = arith.addf %62, %65 : vector<2x128xf32>
    %c3_45 = arith.constant 3 : index
    %c0_46 = arith.constant 0 : index
    %67 = memref.load %arg4[%c3_45, %c0_46] : memref<4x4xf32, #tpu.memory_space<smem>>
    %68 = vector.broadcast %67 : f32 to vector<2x128xf32>
    %69 = arith.mulf %68, %10 : vector<2x128xf32>
    %70 = arith.addf %66, %69 : vector<2x128xf32>
    %c0_47 = arith.constant 0 : index
    %71 = memref.load %arg6[%c0_47] : memref<4xf32, #tpu.memory_space<smem>>
    %72 = math.tanh %70 : vector<2x128xf32>
    %73 = vector.broadcast %71 : f32 to vector<2x128xf32>
    %74 = arith.mulf %73, %72 : vector<2x128xf32>
    %75 = arith.addf %47, %74 : vector<2x128xf32>
    %c1_48 = arith.constant 1 : index
    %76 = memref.load %arg5[%c1_48] : memref<4xf32, #tpu.memory_space<smem>>
    %c0_49 = arith.constant 0 : index
    %c1_50 = arith.constant 1 : index
    %77 = memref.load %arg4[%c0_49, %c1_50] : memref<4x4xf32, #tpu.memory_space<smem>>
    %78 = vector.broadcast %77 : f32 to vector<2x128xf32>
    %79 = arith.mulf %78, %4 : vector<2x128xf32>
    %80 = vector.broadcast %76 : f32 to vector<2x128xf32>
    %81 = arith.addf %80, %79 : vector<2x128xf32>
    %c1_51 = arith.constant 1 : index
    %c1_52 = arith.constant 1 : index
    %82 = memref.load %arg4[%c1_51, %c1_52] : memref<4x4xf32, #tpu.memory_space<smem>>
    %83 = vector.broadcast %82 : f32 to vector<2x128xf32>
    %84 = arith.mulf %83, %6 : vector<2x128xf32>
    %85 = arith.addf %81, %84 : vector<2x128xf32>
    %c2_53 = arith.constant 2 : index
    %c1_54 = arith.constant 1 : index
    %86 = memref.load %arg4[%c2_53, %c1_54] : memref<4x4xf32, #tpu.memory_space<smem>>
    %87 = vector.broadcast %86 : f32 to vector<2x128xf32>
    %88 = arith.mulf %87, %8 : vector<2x128xf32>
    %89 = arith.addf %85, %88 : vector<2x128xf32>
    %c3_55 = arith.constant 3 : index
    %c1_56 = arith.constant 1 : index
    %90 = memref.load %arg4[%c3_55, %c1_56] : memref<4x4xf32, #tpu.memory_space<smem>>
    %91 = vector.broadcast %90 : f32 to vector<2x128xf32>
    %92 = arith.mulf %91, %10 : vector<2x128xf32>
    %93 = arith.addf %89, %92 : vector<2x128xf32>
    %c1_57 = arith.constant 1 : index
    %94 = memref.load %arg6[%c1_57] : memref<4xf32, #tpu.memory_space<smem>>
    %95 = math.tanh %93 : vector<2x128xf32>
    %96 = vector.broadcast %94 : f32 to vector<2x128xf32>
    %97 = arith.mulf %96, %95 : vector<2x128xf32>
    %98 = arith.addf %75, %97 : vector<2x128xf32>
    %c2_58 = arith.constant 2 : index
    %99 = memref.load %arg5[%c2_58] : memref<4xf32, #tpu.memory_space<smem>>
    %c0_59 = arith.constant 0 : index
    %c2_60 = arith.constant 2 : index
    %100 = memref.load %arg4[%c0_59, %c2_60] : memref<4x4xf32, #tpu.memory_space<smem>>
    %101 = vector.broadcast %100 : f32 to vector<2x128xf32>
    %102 = arith.mulf %101, %4 : vector<2x128xf32>
    %103 = vector.broadcast %99 : f32 to vector<2x128xf32>
    %104 = arith.addf %103, %102 : vector<2x128xf32>
    %c1_61 = arith.constant 1 : index
    %c2_62 = arith.constant 2 : index
    %105 = memref.load %arg4[%c1_61, %c2_62] : memref<4x4xf32, #tpu.memory_space<smem>>
    %106 = vector.broadcast %105 : f32 to vector<2x128xf32>
    %107 = arith.mulf %106, %6 : vector<2x128xf32>
    %108 = arith.addf %104, %107 : vector<2x128xf32>
    %c2_63 = arith.constant 2 : index
    %c2_64 = arith.constant 2 : index
    %109 = memref.load %arg4[%c2_63, %c2_64] : memref<4x4xf32, #tpu.memory_space<smem>>
    %110 = vector.broadcast %109 : f32 to vector<2x128xf32>
    %111 = arith.mulf %110, %8 : vector<2x128xf32>
    %112 = arith.addf %108, %111 : vector<2x128xf32>
    %c3_65 = arith.constant 3 : index
    %c2_66 = arith.constant 2 : index
    %113 = memref.load %arg4[%c3_65, %c2_66] : memref<4x4xf32, #tpu.memory_space<smem>>
    %114 = vector.broadcast %113 : f32 to vector<2x128xf32>
    %115 = arith.mulf %114, %10 : vector<2x128xf32>
    %116 = arith.addf %112, %115 : vector<2x128xf32>
    %c2_67 = arith.constant 2 : index
    %117 = memref.load %arg6[%c2_67] : memref<4xf32, #tpu.memory_space<smem>>
    %118 = math.tanh %116 : vector<2x128xf32>
    %119 = vector.broadcast %117 : f32 to vector<2x128xf32>
    %120 = arith.mulf %119, %118 : vector<2x128xf32>
    %121 = arith.addf %98, %120 : vector<2x128xf32>
    %c3_68 = arith.constant 3 : index
    %122 = memref.load %arg5[%c3_68] : memref<4xf32, #tpu.memory_space<smem>>
    %c0_69 = arith.constant 0 : index
    %c3_70 = arith.constant 3 : index
    %123 = memref.load %arg4[%c0_69, %c3_70] : memref<4x4xf32, #tpu.memory_space<smem>>
    %124 = vector.broadcast %123 : f32 to vector<2x128xf32>
    %125 = arith.mulf %124, %4 : vector<2x128xf32>
    %126 = vector.broadcast %122 : f32 to vector<2x128xf32>
    %127 = arith.addf %126, %125 : vector<2x128xf32>
    %c1_71 = arith.constant 1 : index
    %c3_72 = arith.constant 3 : index
    %128 = memref.load %arg4[%c1_71, %c3_72] : memref<4x4xf32, #tpu.memory_space<smem>>
    %129 = vector.broadcast %128 : f32 to vector<2x128xf32>
    %130 = arith.mulf %129, %6 : vector<2x128xf32>
    %131 = arith.addf %127, %130 : vector<2x128xf32>
    %c2_73 = arith.constant 2 : index
    %c3_74 = arith.constant 3 : index
    %132 = memref.load %arg4[%c2_73, %c3_74] : memref<4x4xf32, #tpu.memory_space<smem>>
    %133 = vector.broadcast %132 : f32 to vector<2x128xf32>
    %134 = arith.mulf %133, %8 : vector<2x128xf32>
    %135 = arith.addf %131, %134 : vector<2x128xf32>
    %c3_75 = arith.constant 3 : index
    %c3_76 = arith.constant 3 : index
    %136 = memref.load %arg4[%c3_75, %c3_76] : memref<4x4xf32, #tpu.memory_space<smem>>
    %137 = vector.broadcast %136 : f32 to vector<2x128xf32>
    %138 = arith.mulf %137, %10 : vector<2x128xf32>
    %139 = arith.addf %135, %138 : vector<2x128xf32>
    %c3_77 = arith.constant 3 : index
    %140 = memref.load %arg6[%c3_77] : memref<4xf32, #tpu.memory_space<smem>>
    %141 = math.tanh %139 : vector<2x128xf32>
    %142 = vector.broadcast %140 : f32 to vector<2x128xf32>
    %143 = arith.mulf %142, %141 : vector<2x128xf32>
    %144 = arith.addf %121, %143 : vector<2x128xf32>
    %c0_78 = arith.constant 0 : index
    %c0_79 = arith.constant 0 : index
    %145 = vector.load %arg10[%c0_78, %c0_79] : memref<2x128xf32, #tpu.memory_space<vmem>>, vector<2x128xf32>
    %cst = arith.constant 0.000000e+00 : f32
    %146 = vector.broadcast %cst : f32 to vector<2x128xf32>
    %147 = arith.maximumf %144, %146 : vector<2x128xf32>
    %148 = math.absf %144 : vector<2x128xf32>
    %cst_80 = arith.constant 0.000000e+00 : f32
    %149 = vector.broadcast %cst_80 : f32 to vector<2x128xf32>
    %150 = arith.subf %149, %148 : vector<2x128xf32>
    %151 = math.exp %150 : vector<2x128xf32>
    %cst_81 = arith.constant 1.000000e+00 : f32
    %152 = vector.broadcast %cst_81 : f32 to vector<2x128xf32>
    %153 = arith.addf %152, %151 : vector<2x128xf32>
    %154 = math.log %153 : vector<2x128xf32>
    %155 = arith.addf %147, %154 : vector<2x128xf32>
    %cst_82 = arith.constant 0.000000e+00 : f32
    %156 = vector.broadcast %cst_82 : f32 to vector<2x128xf32>
    %157 = arith.subf %156, %52 : vector<2x128xf32>
    %cst_83 = arith.constant 0.000000e+00 : f32
    %158 = vector.broadcast %cst_83 : f32 to vector<2x128xf32>
    %159 = arith.maximumf %157, %158 : vector<2x128xf32>
    %160 = math.absf %157 : vector<2x128xf32>
    %cst_84 = arith.constant 0.000000e+00 : f32
    %161 = vector.broadcast %cst_84 : f32 to vector<2x128xf32>
    %162 = arith.subf %161, %160 : vector<2x128xf32>
    %163 = math.exp %162 : vector<2x128xf32>
    %cst_85 = arith.constant 1.000000e+00 : f32
    %164 = vector.broadcast %cst_85 : f32 to vector<2x128xf32>
    %165 = arith.addf %164, %163 : vector<2x128xf32>
    %166 = math.log %165 : vector<2x128xf32>
    %167 = arith.addf %159, %166 : vector<2x128xf32>
    %168 = arith.addf %155, %167 : vector<2x128xf32>
    %169 = arith.addf %145, %168 : vector<2x128xf32>
    %c0_86 = arith.constant 0 : index
    %c0_87 = arith.constant 0 : index
    %170 = vector.load %arg10[%c0_86, %c0_87] : memref<2x128xf32, #tpu.memory_space<vmem>>, vector<2x128xf32>
    tpu.vector_store %arg10[%c0_86, %c0_87], %169 {strides = array<i32>} : memref<2x128xf32, #tpu.memory_space<vmem>>, vector<2x128xf32>,
    %c0_i32_88 = arith.constant 0 : i32
    %171 = arith.cmpi eq, %arg1, %c0_i32_88 : i32
    %172 = arith.extui %171 : i1 to i32
    %c0_i32_89 = arith.constant 0 : i32
    %173 = arith.cmpi ne, %172, %c0_i32_89 : i32
    scf.if %173 {
      %c0_90 = arith.constant 0 : index
      %c0_91 = arith.constant 0 : index
      %174 = vector.load %arg10[%c0_90, %c0_91] : memref<2x128xf32, #tpu.memory_space<vmem>>, vector<2x128xf32>
      %cst_92 = arith.constant dense<0.000000e+00> : vector<128xf32>
      %175 = vector.multi_reduction <add>, %174, %cst_92 [0] : vector<2x128xf32> to vector<128xf32>
      %176 = vector.shape_cast %175 : vector<128xf32> to vector<1x128xf32>
      %c0_93 = arith.constant 0 : index
      %c0_94 = arith.constant 0 : index
      %177 = vector.load %arg9[%c0_93, %c0_94] : memref<1x128xf32, #tpu.memory_space<vmem>>, vector<1x128xf32>
      tpu.vector_store %arg9[%c0_93, %c0_94], %176 {strides = array<i32>} : memref<1x128xf32, #tpu.memory_space<vmem>>, vector<1x128xf32>,
    } else {
    }
    return
  }
  func.func @transform_0(%arg0: i32, %arg1: i32) -> (i32, i32, i32, i32) {
    %c0_i32 = arith.constant 0 : i32
    %c0_i32_0 = arith.constant 0 : i32
    %c0_i32_1 = arith.constant 0 : i32
    return %arg0, %c0_i32, %arg1, %c0_i32_0 : i32, i32, i32, i32
  }
  func.func @transform_1(%arg0: i32, %arg1: i32) -> (i32, i32, i32, i32) {
    %c0_i32 = arith.constant 0 : i32
    %c0_i32_0 = arith.constant 0 : i32
    %c0_i32_1 = arith.constant 0 : i32
    return %arg0, %c0_i32, %arg1, %c0_i32_0 : i32, i32, i32, i32
  }
  func.func @transform_2(%arg0: i32, %arg1: i32) -> (i32, i32) {
    %c0_i32 = arith.constant 0 : i32
    %c0_i32_0 = arith.constant 0 : i32
    %c0_i32_1 = arith.constant 0 : i32
    return %c0_i32, %c0_i32_0 : i32, i32
  }
  func.func @transform_3(%arg0: i32, %arg1: i32) -> i32 {
    %c0_i32 = arith.constant 0 : i32
    %c0_i32_0 = arith.constant 0 : i32
    return %c0_i32 : i32
  }
  func.func @transform_4(%arg0: i32, %arg1: i32) -> i32 {
    %c0_i32 = arith.constant 0 : i32
    %c0_i32_0 = arith.constant 0 : i32
    return %c0_i32 : i32
  }
  func.func @transform_5(%arg0: i32, %arg1: i32) -> i32 {
    %c0_i32 = arith.constant 0 : i32
    %c0_i32_0 = arith.constant 0 : i32
    return %c0_i32 : i32
  }
  func.func @transform_6(%arg0: i32, %arg1: i32) -> i32 {
    %c0_i32 = arith.constant 0 : i32
    %c0_i32_0 = arith.constant 0 : i32
    return %c0_i32 : i32
  }
  func.func @transform_7(%arg0: i32, %arg1: i32) -> (i32, i32) {
    %c0_i32 = arith.constant 0 : i32
    %c0_i32_0 = arith.constant 0 : i32
    return %c0_i32, %arg0 : i32, i32
  }
}

</mosaic_0001>

<bundles_post_ra>
// kernel: tpu_custom_call.1
= control target key start
LH: loop header
LB: loop body
LE: loop exit
PB: predicated region body
PF: predicated region fallthrough
CT: control target
= control target key end

     0   :  { %s1633_s0 = inlined_call_operand.hbm [shape: f32[2,4,2,128], index: 0, kind: input, shape index: {}]   ;;  %s1634_s1 = inlined_call_operand.hbm [shape: f32[2,4,2,128], index: 1, kind: input, shape index: {}]   ;;  %s1635_s2 = inlined_call_operand.vmem [shape: f32[4,4], index: 2, kind: input, shape index: {}]   ;;  %s1636_s3 = inlined_call_operand.vmem [shape: f32[4], index: 3, kind: input, shape index: {}]   ;;  %s1637_s4 = inlined_call_operand.vmem [shape: f32[4], index: 4, kind: input, shape index: {}]   ;;  %s1638_s5 = inlined_call_operand.vmem [shape: f32[4], index: 5, kind: input, shape index: {}]   ;;  %s1639_s6 = inlined_call_operand.<no memory space> [shape: f32[1], index: 6, kind: input, shape index: {}]   ;;  %s1640_s7 = inlined_call_operand.hbm [shape: f32[1,256], index: 7, kind: output, shape index: {}]  }
   0x1   :  { %1647 = sst [smem:[#allocation23_spill]] %s1633_s0 }
   0x2   :  { %1648 = sst [smem:[#allocation24_spill]] %s1634_s1 }
   0x3   :  { %1649 = sst [smem:[#allocation25_spill]] %s1635_s2 }
   0x4   :  { %1650 = sst [smem:[#allocation26_spill]] %s1636_s3 }
   0x5   :  { %1651 = sst [smem:[#allocation27_spill]] %s1637_s4 }
   0x6   :  { %1652 = sst [smem:[#allocation28_spill]] %s1638_s5 }
   0x7   :  { %12 = sst [smem:[#allocation3]] %s1639_s6 }
   0x8   :  { %13 = vsyncpa [#allocation5], 0 }
   0x9   :  { %15 = vsyncpa [#allocation5 + $0x1], 0 }
   0xa   :  { %16 = vsyncpa [#allocation9], 0 }
   0xb   :  { %18 = vsyncpa [#allocation9 + $0x1], 0 }
   0xc   :  { %19 = vsyncpa [#allocation7], 0 }
   0xd   :  { %20 = vsyncpa [#allocation12], 0 }
   0xe   :  { %21 = vsyncpa [#allocation15], 0 }
   0xf   :  { %22 = vsyncpa [#allocation6], 0 }
  0x10   :  { %24 = vsyncpa [#allocation6 + $0x1], 0  ;;  %s1191_s26 = smov 0   ;;  %s1193_s27 = smov 0  }
  0x11   :  { %s1195_s28 = smov 0   ;;  %s1197_s29 = smov 0  }
  0x12   :  { %s1199_s30 = smov 0   ;;  %s1201_s6 = smov 0  }
  0x13 LB: > { %s735_s8 = sadd.s32 4294967295, %s1136_s6   ;;  %s736_s9 = sadd.s32 4294967294, %s1136_s6   ;;  %s1136_s6 = sphi %s1201_s6, %s30_s6   ;;  %s1132_s30 = sphi %s1199_s30, %s1680_s30   ;;  %s1128_s29 = sphi %s1197_s29, %s1679_s29   ;;  %s1124_s28 = sphi %s1195_s28, %s1678_s28   ;;  %s1120_s27 = sphi %s1193_s27, %s1677_s27   ;;  %s1116_s26 = sphi %s1191_s26, %s1676_s26  }
  0x14   : > { %p64_p0 = scmp.ne.s32.totalorder %s1120_s27, %s1116_s26  ;;  %p1225_p1 = scmp.eq.s32.totalorder %s735_s8, 0 }
  0x15   : > { %p1229_p2 = scmp.eq.s32.totalorder %s735_s8, 1  ;;  %p227_p3 = scmp.eq.s32.totalorder %s736_s9, 1 }
  0x16   : > { %s1653_s10 = scalar_select %p1225_p1, 1, 0 }
  0x17   : > { %s1654_s11 = scalar_select %p1229_p2, 1, 0 }
  0x18   : > { %p1235_p4 = por %p1225_p1, %p64_p0  ;;  %p737_p5 = scmp.ge.s32.totalorder %s1136_s6, 1 }
  0x19   : > { %p1240_p6 = por %p227_p3, %p64_p0  ;;  %p234_p7 = scmp.lt.s32.totalorder %s1136_s6, 3 }
  0x1a   : > { %s1655_s12 = scalar_select %p1235_p4, 1, 0 }
  0x1b   : > { %s1656_s13 = scalar_select %p1240_p6, 1, 0 }
  0x1c   : > { %s1657_s3 = sld [smem:[#allocation26_spill]]  ;;  %p1248_p8 = pnand %p737_p5, %p234_p7 }
  0x1d   : > { %s1659_s2 = sld [smem:[#allocation25_spill]]  ;;  %s1661_s4 = sld [smem:[#allocation27_spill]] }
  0x1e   : > { %s1658_s17 = scalar_select %p1248_p8, 1, 0 }
  0x1f   : > { %p813_p10 = pneg %p1248_p8 }
  0x21   : > { %p1260_p11 = pnand %p813_p10, %p1225_p1 }
  0x22   : > { %s258_s16 = sshll.u32 %s1657_s3, 4  ;;  %s259_s16 = int_to_ptr.vmem [resolvable:$true] %s258_s16 }
  0x23   : > { %s247_s20 = sshll.u32 %s1659_s2, 4  ;;  %s269_s24 = sshll.u32 %s1661_s4, 4  ;;  %s248_s20 = int_to_ptr.vmem [resolvable:$true] %s247_s20  ;;  %s1267_s24 = int_to_ptr.vmem [resolvable:$true] %s269_s24 }
  0x24   : > { %s918_s25 = scalar_lea.vmem %s259_s16, 16  ;;  %p920_p13 = pneg %p1260_p11 }
  0x25   : > { %p919_p12 = scmp.ne.s32.totalorder %s259_s16, %s918_s25  ;;  %p926_p5 = scmp.lt.s32.totalorder %s259_s16, %s259_s16 }
  0x26   : > { %p927_p7 = scmp.lt.s32.totalorder %s918_s25, %s918_s25 }
  0x27   : > { %p921_p0 = pnand %p920_p13, %p919_p12 }
  0x28   : > { %p928_p10 = por %p927_p7, %p926_p5 }
  0x29   : > { %p922_p3 = pneg %p921_p0 }
  0x2b   : > { %p929_p9 = pnand %p928_p10, %p922_p3 }
  0x2d   : > { %932 = shalt.err (!%p929_p9)
}
  0x2e   : > { %s1138_s8 = smov [#allocation11]   ;;  %s933_s9 = scalar_lea.vmem %s248_s20, 64 }
  0x2f   : > { %819 = dma.vmem_to_smem (!%p1260_p11), %s259_s16, 16, %s1138_s8, [#allocation12]  }
  0x30   : > { %p934_p6 = scmp.ne.s32.totalorder %s248_s20, %s933_s9  ;;  %p941_p8 = scmp.lt.s32.totalorder %s248_s20, %s248_s20 }
  0x31   : > { %p942_p2 = scmp.lt.s32.totalorder %s933_s9, %s933_s9 }
  0x32   : > { %p936_p1 = pnand %p934_p6, %p920_p13 }
  0x33   : > { %p943_p12 = por %p942_p2, %p941_p8 }
  0x34   : > { %p937_p4 = pneg %p936_p1 }
  0x36   : > { %p944_p0 = pnand %p943_p12, %p937_p4 }
  0x38   : > { %947 = shalt.err (!%p944_p0)
}
  0x39   : > { %s1139_s14 = smov [#allocation10]   ;;  %s1662_s5 = sld [smem:[#allocation28_spill]] }
  0x3a   : > { %816 = dma.vmem_to_smem (!%p1260_p11), %s248_s20, 64, %s1139_s14, [#allocation7]  }
  0x3b   : > { %s948_s19 = scalar_lea.vmem %s1267_s24, 16  ;;  %p956_p4 = scmp.lt.s32.totalorder %s1267_s24, %s1267_s24 }
  0x3c   : > { %p949_p6 = scmp.ne.s32.totalorder %s1267_s24, %s948_s19  ;;  %p957_p8 = scmp.lt.s32.totalorder %s948_s19, %s948_s19 }
  0x3e   : > { %p951_p1 = pnand %p949_p6, %p920_p13  ;;  %p958_p9 = por %p957_p8, %p956_p4 }
  0x3f   : > { %s280_s18 = sshll.u32 %s1662_s5, 4  ;;  %s281_s18 = int_to_ptr.vmem [resolvable:$true] %s280_s18 }
  0x40   : > { %p952_p2 = pneg %p951_p1 }
  0x42   : > { %p959_p3 = pnand %p958_p9, %p952_p2 }
  0x44   : > { %962 = shalt.err (!%p959_p3)
}
  0x45   : > { %s1140_s22 = smov [#allocation13]   ;;  %s963_s20 = scalar_lea.vmem %s281_s18, 16 }
  0x46   : > { %822 = dma.vmem_to_smem (!%p1260_p11), %s1267_s24, 16, %s1140_s22, [#allocation12]  }
  0x47   : > { %p964_p5 = scmp.ne.s32.totalorder %s281_s18, %s963_s20  ;;  %p971_p12 = scmp.lt.s32.totalorder %s281_s18, %s281_s18 }
  0x48   : > { %p972_p0 = scmp.lt.s32.totalorder %s963_s20, %s963_s20 }
  0x49   : > { %p966_p7 = pnand %p964_p5, %p920_p13 }
  0x4a   : > { %p973_p6 = por %p972_p0, %p971_p12 }
  0x4b   : > { %p967_p10 = pneg %p966_p7 }
  0x4d   : > { %p974_p1 = pnand %p973_p6, %p967_p10 }
  0x4f   : > { %977 = shalt.err (!%p974_p1)
}
  0x50   : > { %s1141_s23 = smov [#allocation14]   ;;  %s42_s24 = sadd.s32 1, %s1132_s30 }
  0x51   : > { %825 = dma.vmem_to_smem (!%p1260_p11), %s281_s18, 16, %s1141_s23, [#allocation15]  }
  0x52   : > { %s51_s25 = sadd.s32 1, %s1124_s28  ;;  %p44_p13 = scmp.ge.s32.totalorder %s42_s24, 2 }
  0x53   : > { %p58_p2 = scmp.ne.s32.totalorder %s1124_s28, %s1120_s27  ;;  %p59_p4 = scmp.eq.s32.totalorder %s1136_s6, 0 }
  0x54   : > { %p841_p8 = scmp.lt.s32.totalorder %s1136_s6, 2  ;;  %s1682_s24 = smov (%p44_p13, %s42_s24), 0 }
  0x55   : > { %p60_p9 = por %p59_p4, %p58_p2  ;;  %p1663_p3 = scmp.ne.s32.totalorder %s1654_s11, 0 }
  0x56   : > { %s46_s8 = ssub.s32 %s1132_s30, %s1682_s24  ;;  %s1316_s9 = sand.u32 1, %s1124_s28  }
  0x57   : > { %p1309_p5 = por %p1663_p3, %p58_p2  ;;  %p49_p11 = scmp.eq.s32.totalorder %s46_s8, 0 }
  0x58   : > { %s1645_s14 = sshll.u32 %s1316_s9, 3  ;;  %s1646_s15 = sshll.u32 %s1132_s30, 7 }
  0x59   : > { %s1321_s16 = scalar_select %p49_p11, %s1124_s28, %s51_s25  }
  0x5a   : > { %s1665_s0 = sld [smem:[#allocation23_spill]]  ;;  %s298_s22 = scalar_lea.vmem [#allocation4], %s1645_s14 }
  0x5b   : > { %s306_s20 = sshll.u32 %s298_s22, 4  ;;  %p1334_p7 = pnand %p841_p8, %p60_p9  ;;  %s1338_s20 = int_to_ptr.vmem [resolvable:$true] %s306_s20 }
  0x5d   : > { %p980_p12 = pneg %p1334_p7 }
  0x60   : > { %s1328_s11 = scalar_lea.hbm %s1665_s0, %s1646_s15  ;;  %s983_s22 = scalar_lea.hbm %s1665_s0, 256 }
  0x61   : > { %s978_s8 = scalar_lea.hbm %s1328_s11, 128  ;;  %p984_p1 = scmp.lt.u32.totalorder %s1328_s11, %s1665_s0 }
  0x62   : > { %p979_p10 = scmp.ne.s32.totalorder %s1328_s11, %s978_s8  ;;  %p985_p13 = scmp.lt.u32.totalorder %s983_s22, %s978_s8 }
  0x63   : > { %p987_p4 = scmp.lt.u32.totalorder %s978_s8, %s1328_s11 }
  0x64   : > { %p981_p0 = pnand %p980_p12, %p979_p10  ;;  %p986_p2 = por %p985_p13, %p984_p1 }
  0x66   : > { %p982_p6 = pneg %p981_p0  ;;  %p988_p8 = por %p987_p4, %p986_p2 }
  0x68   : > { %p989_p9 = pnand %p988_p8, %p982_p6 }
  0x6a   : > { %992 = shalt.err (!%p989_p9)
}
  0x6b   : > { %s993_s25 = scalar_lea.vmem %s1338_s20, 128  ;;  %s1142_s18 = smov [#allocation4]  }
  0x6c   : > { %p994_p3 = scmp.ne.s32.totalorder %s1338_s20, %s993_s25  ;;  %s998_s19 = sshll.u32 %s1142_s18, 4  ;;  %s999_s19 = int_to_ptr.vmem [resolvable:$false] %s998_s19 }
  0x6d   : > { %s1000_s14 = scalar_lea.vmem %s999_s19, 256  ;;  %p1001_p0 = scmp.lt.s32.totalorder %s1338_s20, %s999_s19 }
  0x6e   : > { %p996_p11 = pnand %p994_p3, %p980_p12  ;;  %p1002_p1 = scmp.lt.s32.totalorder %s1000_s14, %s993_s25 }
  0x70   : > { %p997_p10 = pneg %p996_p11  ;;  %p1003_p13 = por %p1002_p1, %p1001_p0 }
  0x72   : > { %p1004_p2 = pnand %p1003_p13, %p997_p10 }
  0x74   : > { %1007 = shalt.err (!%p1004_p2)
}
  0x75   : > { %s1143_s15 = smov 32   ;;  %s1144_s8 = smov 2  }
  0x76   : > { %s1667_s22 = scalar_lea.sflag [#allocation5], %s1316_s9  ;;  %s1668_s25 = sshll.u32 %s1132_s30, 7 }
  0x77   : > { %829 = dma.hbm_to_vmem [thread:$0]  (!%p1334_p7), %s1328_s11, 128, %s1338_s20, %s1667_s22, %s1143_s15, %s1143_s15, %s1144_s8  }
  0x78   : > { %s1669_s1 = sld [smem:[#allocation24_spill]]  ;;  %s1670_s0 = sshll.u32 %s1316_s9, 3 }
  0x79   : > { %s320_s2 = scalar_lea.vmem [#allocation8], %s1670_s0  ;;  %s317_s4 = scalar_lea.sflag [#allocation9], %s1316_s9 }
  0x7a   : > { %s328_s3 = sshll.u32 %s320_s2, 4  ;;  %s1380_s3 = int_to_ptr.vmem [resolvable:$true] %s328_s3 }
  0x7e   : > { %s1376_s14 = scalar_lea.hbm %s1669_s1, %s1668_s25  ;;  %s1013_s22 = scalar_lea.hbm %s1669_s1, 256 }
  0x7f   : > { %s1008_s5 = scalar_lea.hbm %s1376_s14, 128  ;;  %p1014_p9 = scmp.lt.u32.totalorder %s1376_s14, %s1669_s1 }
  0x80   : > { %p1009_p6 = scmp.ne.s32.totalorder %s1376_s14, %s1008_s5  ;;  %p1015_p3 = scmp.lt.u32.totalorder %s1013_s22, %s1008_s5 }
  0x81   : > { %p1017_p10 = scmp.lt.u32.totalorder %s1008_s5, %s1376_s14 }
  0x82   : > { %p1011_p4 = pnand %p1009_p6, %p980_p12  ;;  %p1016_p11 = por %p1015_p3, %p1014_p9 }
  0x84   : > { %p1012_p8 = pneg %p1011_p4  ;;  %p1018_p0 = por %p1017_p10, %p1016_p11 }
  0x86   : > { %p1019_p1 = pnand %p1018_p0, %p1012_p8 }
  0x88   : > { %1022 = shalt.err (!%p1019_p1)
}
  0x89   : > { %s1023_s0 = scalar_lea.vmem %s1380_s3, 128  ;;  %s1145_s2 = smov [#allocation8]  }
  0x8a   : > { %p1024_p13 = scmp.ne.s32.totalorder %s1380_s3, %s1023_s0  ;;  %s1028_s19 = sshll.u32 %s1145_s2, 4  ;;  %s1029_s19 = int_to_ptr.vmem [resolvable:$false] %s1028_s19 }
  0x8b   : > { %s1030_s11 = scalar_lea.vmem %s1029_s19, 256  ;;  %p1031_p4 = scmp.lt.s32.totalorder %s1380_s3, %s1029_s19 }
  0x8c   : > { %p1026_p2 = pnand %p1024_p13, %p980_p12  ;;  %p1032_p9 = scmp.lt.s32.totalorder %s1030_s11, %s1023_s0 }
  0x8e   : > { %p1027_p6 = pneg %p1026_p2  ;;  %p1033_p3 = por %p1032_p9, %p1031_p4 }
  0x90   : > { %p1034_p11 = pnand %p1033_p3, %p1027_p6 }
  0x92   : > { %1037 = shalt.err (!%p1034_p11)
}
  0x93   : > { %832 = dma.hbm_to_vmem [thread:$0]  (!%p1334_p7), %s1376_s14, 128, %s1380_s3, %s317_s4, %s1143_s15, %s1143_s15, %s1144_s8  }
  0x94   : > { %p1671_p12 = scmp.ne.s32.totalorder %s1658_s17, 0 }
  0x95   : > { %s1414_s5 = sand.u32 (!%p1671_p12), 1, %s1120_s27   ;;  %p1672_p8 = scmp.ne.s32.totalorder (!%p1671_p12), %s1655_s12, 0 }
  0x96   : > { %340 = sbr.rel (%p1671_p12) target bundleno = 289 (0x121), region = 48  ;;  %s750_s20 = sshll.u32 (!%p1671_p12), %s1414_s5, 3 }
  0x97   : > { %s343_s22 = scalar_lea.sflag (!%p1671_p12), [#allocation5], %s1414_s5  ;;  %s1418_s23 = scalar_lea.vmem (!%p1671_p12), [#allocation4], %s750_s20 }
  0x9d   : > { %1091 = dma.done.wait (%p1672_p8), %s343_s22, 128  }
  0x9e   : > { %1093 = vsyncadd (%p1672_p8), %s343_s22, 4294967168  ;;  %s352_s3 = scalar_lea.sflag [#allocation9], %s1414_s5  ;;  %s1425_s4 = scalar_lea.vmem [#allocation8], %s750_s20 }
  0x9f   : > { %1095 = dma.done.wait (%p1672_p8), %s352_s3, 128  }
  0xa0   : > { %1097 = vsyncadd (%p1672_p8), %s352_s3, 4294967168  ;;  %p1673_p7 = scmp.ne.s32.totalorder %s1653_s10, 0 }
  0xa2   : > { %1099 = dma.done.wait (%p1673_p7), [#allocation7], 64  }
  0xa3   : > { %1101 = vsyncadd (%p1673_p7), [#allocation7], 4294967232 }
  0xa4   : > { %1103 = dma.done.wait (%p1673_p7), [#allocation12], 32  }
  0xa5   : > { %1105 = vsyncadd (%p1673_p7), [#allocation12], 4294967264 }
  0xa6   : > { %1107 = dma.done.wait (%p1673_p7), [#allocation15], 16  }
  0xa7   : > { %1109 = vsyncadd (%p1673_p7), [#allocation15], 4294967280 }
  0xa8   : > { %376 = sfence }
  0xa9   : > { %v1146_v0 = vmov 0.0   ;;  %s1443_s12 = sld [smem:[#allocation3]]  ;;  %s427_s17 = sld [smem:[#allocation14]]  ;;  %v1456_v1 = vld [vmem:[%s1418_s23] sm:$0x3]  ;;  %vm571_vm0 = vcmask 1041408  }
  0xaa   : > { %411 = vst [vmem:[#allocation2] sm:$0x3] %v1146_v0  ;;  %s1445_s9 = sld [smem:[#allocation13]]  ;;  %s762_s15 = sld [smem:[#allocation14 + $0x1]]  ;;  %v1463_v2 = vld [vmem:[%s1418_s23 + $0x2] sm:$0x3] }
  0xab   : > { %s1447_s8 = sld [smem:[#allocation13 + $0x1]]  ;;  %s1449_s14 = sld [smem:[#allocation14 + $0x2]]  ;;  %v419_v3 = vld [vmem:[%s1425_s4] sm:$0x3]  ;;  %v1471_v4 = vld [vmem:[%s1418_s23 + $0x4] sm:$0x3] }
  0xac   : > { %s1451_s10 = sld [smem:[#allocation13 + $0x2]]  ;;  %s1453_s25 = sld [smem:[#allocation14 + $0x3]]  ;;  %v759_v5 = vld [vmem:[%s1425_s4 + $0x2] sm:$0x3]  ;;  %v760_v8 = vld [vmem:[%s1425_s4 + $0x4] sm:$0x3] }
  0xad   : > { %s1458_s18 = sld [smem:[#allocation13 + $0x3]]  ;;  %s1460_s0 = sld [smem:[#allocation11]]  ;;  %v761_v12 = vld [vmem:[%s1425_s4 + $0x6] sm:$0x3]  ;;  %v1503_v21 = vld [vmem:[%s1418_s23 + $0x6] sm:$0x3] }
  0xae   : > { %s1466_s2 = sld [smem:[#allocation10]]  ;;  %s1482_s22 = sld [smem:[#allocation11 + $0x1]] }
  0xaf   : > { %s1468_s19 = sld [smem:[#allocation10 + $0x80]]  ;;  %v428_v6 = vstv %s427_s17  ;;  %v430_v7 = vstv %s1443_s12  ;;  %s1484_s3 = sld [smem:[#allocation10 + $0x1]] }
  0xb0   : > { %s1475_s11 = sld [smem:[#allocation10 + $0x100]]  ;;  %v429_v9 = vmul.f32 %v428_v6, %v1456_v1  ;;  %v433_v10 = vstv %s1445_s9  ;;  %v436_v11 = vstv %s762_s15  ;;  %s1492_s12 = sld [smem:[#allocation10 + $0x81]] }
  0xb1   : > { %s1477_s20 = sld [smem:[#allocation10 + $0x180]]  ;;  %v434_v13 = vmul.f32 %v433_v10, %v419_v3  ;;  %v437_v14 = vmul.f32 %v1463_v2, %v436_v11  ;;  %v440_v15 = vstv %s1447_s8  ;;  %v444_v16 = vstv %s1449_s14  ;;  %s1494_s17 = sld [smem:[#allocation10 + $0x101]] }
  0xb2   : > { %v431_v17 = vadd.f32 %v430_v7, %v429_v9  ;;  %v441_v18 = vmul.f32 %v759_v5, %v440_v15  ;;  %v445_v19 = vmul.f32 %v1471_v4, %v444_v16  ;;  %v448_v20 = vstv %s1451_s10  ;;  %s1500_s4 = sld [smem:[#allocation10 + $0x181]]  ;;  %s1510_s15 = sld [smem:[#allocation11 + $0x2]] }
  0xb3   : > { %v449_v22 = vmul.f32 %v760_v8, %v448_v20  ;;  %v452_v23 = vstv %s1453_s25  ;;  %v456_v24 = vstv %s1458_s18  ;;  %v464_v25 = vstv %s1460_s0  ;;  %s1512_s14 = sld [smem:[#allocation10 + $0x2]]  ;;  %s1529_s0 = sld [smem:[#allocation10 + $0x3]] }
  0xb4   : > { %v438_v26 = vadd.f32 %v437_v14, %v431_v17  ;;  %v442_v27 = vadd.f32 %v441_v18, %v434_v13  ;;  %v453_v28 = vmul.f32 %v1503_v21, %v452_v23  ;;  %v457_v29 = vmul.f32 %v761_v12, %v456_v24  ;;  %s1517_s23 = sld [smem:[#allocation10 + $0x82]]  ;;  %s786_s8 = sshll.u32 %s1128_s29, 4 }
  0xb5   : > { %s1519_s1 = sld [smem:[#allocation10 + $0x102]]  ;;  %v462_v30 = vstv %s1466_s2  ;;  %v467_v31 = vstv %s1468_s19  ;;  %v483_v40 = vstv %s1484_s3  ;;  %v485_v41 = vstv %s1482_s22  ;;  %s1535_s2 = sld [smem:[#allocation11 + $0x3]] }
  0xb6   : > { %v471_v32 = vstv %s1475_s11  ;;  %s1525_s25 = sld [smem:[#allocation10 + $0x182]]  ;;  %v446_v34 = vadd.f32 %v445_v19, %v438_v26  ;;  %v450_v35 = vadd.f32 %v449_v22, %v442_v27  ;;  %v463_v36 = vmul.f32 %v462_v30, %v1456_v1  ;;  %s1537_s19 = sld [smem:[#allocation10 + $0x83]] }
  0xb7   : > { %v475_v33 = vstv %s1477_s20  ;;  %v468_v37 = vmul.f32 %v1463_v2, %v467_v31  ;;  %v472_v38 = vmul.f32 %v1471_v4, %v471_v32  ;;  %v484_v45 = vmul.f32 %v483_v40, %v1456_v1  ;;  %s1540_s11 = sld [smem:[#allocation10 + $0x103]]  ;;  %s1586_s22 = scalar_lea.hbm %s1640_s7, %s786_s8 }
  0xb8   : > { %v476_v39 = vmul.f32 %v1503_v21, %v475_v33  ;;  %v454_v42 = vadd.f32 %v453_v28, %v446_v34  ;;  %v458_v43 = vadd.f32 %v457_v29, %v450_v35  ;;  %v465_v44 = vadd.f32 %v464_v25, %v463_v36  ;;  %s1546_s20 = sld [smem:[#allocation10 + $0x183]]  ;;  %s581_s3 = scalar_lea.sflag [#allocation6], %s1414_s5 }
  0xb9   : > { %v488_v46 = vstv %s1492_s12  ;;  %v492_v47 = vstv %s1494_s17  ;;  %v496_v48 = vstv %s1500_s4  ;;  %v504_v49 = vstv %s1512_s14  ;;  %s1147_s29 = smov [#allocation16]  }
  0xba   : > { %v1548_v50 = vadd.f32 %v458_v43, %v454_v42  ;;  %v469_v51 = vadd.f32 %v468_v37, %v465_v44  ;;  %v486_v52 = vadd.f32 %v485_v41, %v484_v45  ;;  %v489_v53 = vmul.f32 %v1463_v2, %v488_v46  ;;  %s1042_s17 = sshll.u32 %s1147_s29, 4  ;;  %s1043_s17 = int_to_ptr.vmem [resolvable:$false] %s1042_s17 }
  0xbb   : > { %v493_v54 = vmul.f32 %v1471_v4, %v492_v47  ;;  %v497_v55 = vmul.f32 %v1503_v21, %v496_v48  ;;  %v505_v56 = vmul.f32 %v504_v49, %v1456_v1  ;;  %v506_v57 = vstv %s1510_s15  ;;  %s1044_s4 = scalar_lea.vmem %s1043_s17, 32 }
  0xbc   : > { %v473_v58 = vadd.f32 %v472_v38, %v469_v51  ;;  %v490_v59 = vadd.f32 %v489_v53, %v486_v52  ;;  %v509_v60 = vstv %s1517_s23  ;;  %v513_v61 = vstv %s1519_s1  ;;  %v544_v53 = vld [vmem:[#allocation2] sm:$0x3]  ;;  %s406_s1 = scalar_lea.vmem [#allocation16], %s1414_s5 }
  0xbd   : > { %v507_v62 = vadd.f32 %v506_v57, %v505_v56  ;;  %v510_v63 = vmul.f32 %v1463_v2, %v509_v60  ;;  %v514_v0 = vmul.f32 %v1471_v4, %v513_v61  ;;  %v517_v3 = vstv %s1525_s25  ;;  %s593_s9 = sshll.u32 %s406_s1, 4  ;;  %s1581_s9 = int_to_ptr.vmem [resolvable:$true] %s593_s9 }
  0xbe   : > { %v477_v5 = vadd.f32 %v476_v39, %v473_v58  ;;  %v494_v6 = vadd.f32 %v493_v54, %v490_v59  ;;  %v518_v7 = vmul.f32 %v1503_v21, %v517_v3  ;;  %v525_v8 = vstv %s1529_s0  ;;  %s1038_s12 = scalar_lea.vmem %s1581_s9, 16  ;;  %p1045_p13 = scmp.lt.s32.totalorder %s1581_s9, %s1043_s17 }
  0xbf   : > { %v511_v9 = vadd.f32 %v510_v63, %v507_v62  ;;  %v526_v11 = vmul.f32 %v525_v8, %v1456_v1  ;;  %v527_v12 = vstv %s1535_s2  ;;  %v530_v13 = vstv %s1537_s19  ;;  %p1039_p10 = scmp.ne.s32.totalorder %s1581_s9, %s1038_s12  ;;  %p1046_p2 = scmp.lt.s32.totalorder %s1044_s4, %s1038_s12 }
  0xc0   : > { %902 = vtanh.f32 %v477_v5  ;;  %v498_v14 = vadd.f32 %v497_v55, %v494_v6  ;;  %v531_v16 = vmul.f32 %v1463_v2, %v530_v13  ;;  %v534_v17 = vstv %s1540_s11 }
  0xc1   : > { %v515_v18 = vadd.f32 %v514_v0, %v511_v9  ;;  %v528_v19 = vadd.f32 %v527_v12, %v526_v11  ;;  %v535_v22 = vmul.f32 %v1471_v4, %v534_v17  ;;  %v538_v23 = vstv %s1546_s20  ;;  %p1040_p0 = pnand %p1039_p10, %p1309_p5  ;;  %p1047_p6 = por %p1046_p2, %p1045_p13 }
  0xc2   : > { %904 = vtanh.f32 %v498_v14  ;;  %v539_v1 = vmul.f32 %v1503_v21, %v538_v23  ;;  %v554_v27 = vsub.f32 0.0, %v1548_v50 }
  0xc3   : > { %v519_v25 = vadd.f32 %v518_v7, %v515_v18  ;;  %v532_v26 = vadd.f32 %v531_v16, %v528_v19  ;;  %p1041_p1 = pneg %p1040_p0 }
  0xc4   : > { %v556_v29 = vand.u32 2147483647, %v554_v27  ;;  %v555_v48 = vmax.f32 %v554_v27, 0.0 }
  0xc5   : > { %906 = vtanh.f32 %v519_v25  ;;  %v536_v28 = vadd.f32 %v535_v22, %v532_v26  ;;  %p1048_p4 = pnand %p1047_p6, %p1041_p1 }
  0xc6   : > { %v557_v32 = vsub.f32 0.0, %v556_v29 }
  0xc7   : > { %v540_v2 = vadd.f32 %v539_v1, %v536_v28 }
  0xc8   : > { %v558_v37 = vmul.f32 1.442695, %v557_v32 }
  0xc9   : > { %908 = vtanh.f32 %v540_v2 }
  0xca   : > { %v903_v30 = vpop.eup %902  ;;  %910 = vpow2.f32 %v558_v37 }
  0xcb   : > { %v479_v31 = vmul.f32 %v903_v30, %v433_v10 }
  0xcc   : > { %v905_v4 = vpop.eup %904 }
  0xcd   : > { %v480_v33 = vadd.f32 %v479_v31, %v454_v42  ;;  %v500_v34 = vmul.f32 %v905_v4, %v440_v15 }
  0xcf   : > { %v907_v35 = vpop.eup %906  ;;  %v501_v36 = vadd.f32 %v500_v34, %v480_v33 }
  0xd0   : > { %v521_v21 = vmul.f32 %v907_v35, %v448_v20 }
  0xd2   : > { %v522_v38 = vadd.f32 %v521_v21, %v501_v36 }
  0xd3   : > { %v909_v39 = vpop.eup %908 }
  0xd4   : > { %v542_v40 = vmul.f32 %v909_v39, %v456_v24  ;;  %v911_v10 = vpop.eup %910 }
  0xd5   : > { %v560_v46 = vadd.f32 1.0, %v911_v10 }
  0xd6   : > { %v543_v41 = vadd.f32 %v542_v40, %v522_v38 }
  0xd8   : > { %v546_v43 = vand.u32 2147483647, %v543_v41  ;;  %v545_v49 = vmax.f32 %v543_v41, 0.0 }
  0xda   : > { %v547_v44 = vsub.f32 0.0, %v546_v43 }
  0xdc   : > { %v548_v45 = vmul.f32 1.442695, %v547_v44 }
  0xde   : > { %912 = vpow2.f32 %v548_v45 }
  0xdf   : > { %914 = vlog2.f32 %v560_v46 }
  0xe8   : > { %v913_v42 = vpop.eup %912 }
  0xe9   : > { %v550_v15 = vadd.f32 1.0, %v913_v42  ;;  %v915_v47 = vpop.eup %914 }
  0xea   : > { %v562_v20 = vmul.f32 0.6931472, %v915_v47 }
  0xeb   : > { %916 = vlog2.f32 %v550_v15 }
  0xec   : > { %v563_v24 = vadd.f32 %v562_v20, %v555_v48 }
  0xf5   : > { %v917_v50 = vpop.eup %916 }
  0xf6   : > { %v552_v51 = vmul.f32 0.6931472, %v917_v50 }
  0xf8   : > { %v553_v52 = vadd.f32 %v552_v51, %v545_v49 }
  0xfa   : > { %v564_v54 = vadd.f32 %v563_v24, %v553_v52 }
  0xfc   : > { %v565_v55 = vadd.f32 %v564_v54, %v544_v53 }
  0xfe   : > { %566 = vst [vmem:[#allocation2] sm:$0x3] %v565_v55 }
 0x105   : > { %v570_v56 = vld [vmem:[#allocation2] sm:$0x3] }
 0x106   : > { %v572_v57 = vsel %vm571_vm0, %v570_v56, 0.0 }
 0x107   : > { %v573_v58 = vrot.slane %v572_v57, 4 }
 0x109   : > { %v574_v59 = vadd.f32 %v573_v58, %v572_v57 }
 0x10b   : > { %v575_v60 = vrot.slane %v574_v59, 2 }
 0x10d   : > { %v576_v61 = vadd.f32 %v575_v60, %v574_v59 }
 0x10f   : > { %v577_v62 = vrot.slane %v576_v61, 1 }
 0x111   : > { %v578_v63 = vadd.f32 %v577_v62, %v576_v61 }
 0x113   : > { %579 = vst [vmem:[%s406_s1] sm:$0x1] %v578_v63 }
 0x114   : > { %1051 = shalt.err (!%p1048_p4)
}
 0x115   : > { %s1052_s5 = scalar_lea.hbm %s1586_s22, 16  ;;  %s1056_s23 = scalar_lea.hbm %s1640_s7, 32 }
 0x116   : > { %p1053_p9 = scmp.ne.s32.totalorder %s1586_s22, %s1052_s5  ;;  %p1057_p12 = scmp.lt.u32.totalorder %s1586_s22, %s1640_s7 }
 0x117   : > { %p1058_p8 = scmp.lt.u32.totalorder %s1056_s23, %s1052_s5  ;;  %p1060_p10 = scmp.lt.u32.totalorder %s1052_s5, %s1586_s22 }
 0x118   : > { %p1054_p3 = pnand %p1053_p9, %p1309_p5 }
 0x119   : > { %p1059_p7 = por %p1058_p8, %p1057_p12 }
 0x11a   : > { %p1055_p11 = pneg %p1054_p3 }
 0x11b   : > { %p1061_p0 = por %p1060_p10, %p1059_p7 }
 0x11d   : > { %p1062_p1 = pnand %p1061_p0, %p1055_p11 }
 0x11f   : > { %1065 = shalt.err (!%p1062_p1)
}
 0x120   : > { %811 = dma.vmem_to_hbm [thread:$0]  (%p1309_p5), %s1581_s9, 16, %s1586_s22, %s581_s3  }
 0x121 PF: > { %s605_s2 = sand.u32 1, %s1116_s26   ;;  %p1674_p13 = scmp.ne.s32.totalorder %s1656_s13, 0 }
 0x122   : > { %p1675_p2 = scmp.ge.s32.totalorder %s1136_s6, 2  ;;  %s606_s19 = scalar_lea.sflag [#allocation6], %s605_s2 }
 0x124   : > { %p834_p6 = pnand %p1675_p2, %p1674_p13 }
 0x126   : > { %1111 = dma.done.wait (!%p834_p6), %s606_s19, 16  }
 0x127   : > { %1113 = vsyncadd (!%p834_p6), %s606_s19, 4294967280  ;;  %s30_s6 = sadd.s32 1, %s1136_s6   ;;  %s1676_s26 = smov %s1120_s27 }
 0x128   : > { %p27_p4 = scmp.ge.s32.totalorder %s30_s6, 4   ;;  %s1677_s27 = smov %s1124_s28 }
 0x129   : > { %s1678_s28 = smov %s1321_s16  ;;  %s1679_s29 = smov %s1132_s30 }
 0x12a   : > { %s1680_s30 = smov %s1682_s24  ;;  %29 = sbr.rel (!%p27_p4) target bundleno = 19 (0x13), region = 137 }
 0x131   :  { %610 = vsyncpa [#allocation5], 1 }
 0x132   :  { %612 = vsyncpa [#allocation5 + $0x1], 1 }
 0x133   :  { %613 = vsyncpa [#allocation9], 1 }
 0x134   :  { %615 = vsyncpa [#allocation9 + $0x1], 1 }
 0x135   :  { %616 = vsyncpa [#allocation6], 1 }
 0x136   :  { %618 = vsyncpa [#allocation6 + $0x1], 1 }
 0x137   :  { %619 = vsyncpa [#allocation7], 1 }
 0x138   :  { %621 = vsyncpa [#allocation7 + $0x1], 1 }
 0x139   :  { %622 = vsyncpa [#allocation12], 1 }
 0x13a   :  { %623 = vsyncpa [#allocation15], 1 }

</bundles_post_ra>
